<compile_context>
chip_gen: v5e
topology: v5e:2x2
jax: 0.10.0
libtpu: 0.0.40
codegen_flags: <defaults>
</compile_context>

<pallas_src>
import functools

import jax
import jax.numpy as jnp
from jax import lax
from jax.experimental import pallas as pl
from jax.experimental.pallas import tpu as pltpu


def _round_up(x, m):
    return -(-x // m) * m


# --------------------------------------------------------------------------
# Kernel: grid = (batch_shards, time_chunks); TC timesteps per grid step.
# --------------------------------------------------------------------------
def _lstm_value_kernel(seq_len, has_pad,
                       obs_ref, h0_ref, c0_ref, w_ref, b_ref, wfc_ref, bfc_ref,
                       val_ref, hN_ref, cN_ref,
                       h_hist):
    chunk = pl.program_id(1)
    TC, TB, OP = obs_ref.shape          # time chunk, batch shard, padded obs width
    H = h0_ref.shape[1]
    wdt = w_ref.dtype

    # The constant-index (per batch shard) h_n / c_n output refs are the carry.
    @pl.when(chunk == 0)
    def _():
        hN_ref[...] = h0_ref[...]
        cN_ref[...] = c0_ref[...]

    # Hoist weight/bias loads out of the unrolled step loop.
    w_x = w_ref[0:OP, :]                # (OP, 4H)   sublane-aligned static slice
    w_h = w_ref[OP:, :]                 # (H, 4H)
    bias = b_ref[...]                   # (1, 4H)    f32

    def step(tau, carry):
        h, c = carry
        x = obs_ref[tau]                # (TB, OP) f32

        # gates = x @ W_ih^T + h @ W_hh^T + (b_ih + b_hh); PyTorch order i|f|g|o.
        gates = (
            jnp.dot(x.astype(wdt), w_x, preferred_element_type=jnp.float32)
            + jnp.dot(h.astype(wdt), w_h, preferred_element_type=jnp.float32)
            + bias
        )                               # (TB, 4H) f32

        if H % 128 == 0:
            # 128-lane-aligned gate bands: slices are free views, per-band EUP.
            i_g = jax.nn.sigmoid(gates[:, 0 * H:1 * H])
            f_g = jax.nn.sigmoid(gates[:, 1 * H:2 * H])
            g_g = jnp.tanh(gates[:, 2 * H:3 * H])
            o_g = jax.nn.sigmoid(gates[:, 3 * H:4 * H])
        else:
            # Unaligned bands: full-width sigmoid + tanh with a lane-mask select.
            lane = lax.broadcasted_iota(jnp.int32, gates.shape, 1)
            is_g = (lane >= 2 * H) & (lane < 3 * H)
            act = jnp.where(is_g, jnp.tanh(gates), jax.nn.sigmoid(gates))
            i_g = act[:, 0 * H:1 * H]
            f_g = act[:, 1 * H:2 * H]
            g_g = act[:, 2 * H:3 * H]
            o_g = act[:, 3 * H:4 * H]

        c_new = f_g * c + i_g * g_g
        h_new = o_g * jnp.tanh(c_new)
        h_hist[tau] = h_new             # per-chunk history for the value head

        if has_pad:
            # Freeze the carry on padded timesteps so h_n / c_n stay exact.
            keep = (chunk * TC + tau) < seq_len
            h_new = jnp.where(keep, h_new, h)
            c_new = jnp.where(keep, c_new, c)
        return (h_new, c_new)

    h, c = lax.fori_loop(0, TC, step, (hN_ref[...], cN_ref[...]), unroll=True)
    hN_ref[...] = h
    cN_ref[...] = c

    # Value head for the whole chunk: VPU multiply + lane reduce (no N=1 MXU dot),
    # stored as one lane-dense (TC, TB) slab per chunk.
    w_row = wfc_ref[...].astype(jnp.float32).reshape(1, 1, H)
    vals = jnp.sum(h_hist[...] * w_row, axis=-1) + bfc_ref[...]     # (TC, TB)
    val_ref[0] = vals


# --------------------------------------------------------------------------
# Wrappers
# --------------------------------------------------------------------------
def recurrent_value_sequence(obs_seq, params, hidden_state=None, *,
                             time_block=32, batch_block=None,
                             vmem_limit_bytes=None):
    """Fused multi-step forward.

    obs_seq: (T, B, obs_dim) float32
    returns (values (T, B, 1), (h_n (1, B, H), c_n (1, B, H)))
    """
    T, B, obs_dim = obs_seq.shape
    H = params["w_fc"].shape[1]
    OP = params["w_gates"].shape[0] - H
    assert obs_dim <= OP, "obs_dim larger than packed weight expects"

    TB = B if batch_block is None else batch_block
    assert B % TB == 0, "batch_block must divide B"
    NB = B // TB

    # Time chunking: whole sequence in one block when short, else 8-aligned chunks.
    TC = T if T <= time_block else _round_up(time_block, 8)
    T_pad = _round_up(T, TC)
    NC = T_pad // TC

    obs = obs_seq.astype(jnp.float32)
    if OP > obs_dim or T_pad > T:
        obs = jnp.pad(obs, ((0, T_pad - T), (0, 0), (0, OP - obs_dim)))

    if hidden_state is None:
        h0 = jnp.zeros((B, H), jnp.float32)
        c0 = jnp.zeros((B, H), jnp.float32)
    else:
        h0 = hidden_state[0].reshape(B, H).astype(jnp.float32)
        c0 = hidden_state[1].reshape(B, H).astype(jnp.float32)

    kernel = functools.partial(_lstm_value_kernel, T, T_pad != T)
    const = lambda b, c: (0, 0)

    vals, h_n, c_n = pl.pallas_call(
        kernel,
        grid=(NB, NC),
        in_specs=[
            pl.BlockSpec((TC, TB, OP), lambda b, c: (c, b, 0)),     # obs chunk
            pl.BlockSpec((TB, H), lambda b, c: (b, 0)),             # h0
            pl.BlockSpec((TB, H), lambda b, c: (b, 0)),             # c0
            pl.BlockSpec((OP + H, 4 * H), const),                   # packed gate weight
            pl.BlockSpec((1, 4 * H), const),                        # packed gate bias
            pl.BlockSpec((1, H), const),                            # fc weight row
            pl.BlockSpec((1, 1), const),                            # fc bias
        ],
        out_specs=(
            pl.BlockSpec((1, TC, TB), lambda b, c: (b, c, 0)),      # value slab
            pl.BlockSpec((TB, H), lambda b, c: (b, 0)),             # h_n (carry)
            pl.BlockSpec((TB, H), lambda b, c: (b, 0)),             # c_n (carry)
        ),
        out_shape=(
            jax.ShapeDtypeStruct((NB, T_pad, TB), jnp.float32),
            jax.ShapeDtypeStruct((B, H), jnp.float32),
            jax.ShapeDtypeStruct((B, H), jnp.float32),
        ),
        scratch_shapes=[
            pltpu.VMEM((TC, TB, H), jnp.float32),                   # per-chunk h history
        ],
        compiler_params=pltpu.CompilerParams(
            dimension_semantics=("parallel", "arbitrary"),
            vmem_limit_bytes=vmem_limit_bytes),
    )(obs, h0, c0, params["w_gates"], params["b_gates"],
      params["w_fc"], params["b_fc"])

    # (NB, T_pad, TB) -> (T, B, 1)
    values = vals.transpose(1, 0, 2).reshape(T_pad, B)[:T, :, None]
    return values, (h_n.reshape(1, B, H), c_n.reshape(1, B, H))


def recurrent_value_forward(obs, params, hidden_state=None):
    """Exact equivalent of RecurrentValueNetwork.forward: one timestep.

    obs: (B, obs_dim) -> (value (B, 1), (h_n (1, B, H), c_n (1, B, H)))
    """
    values, hidden_state = recurrent_value_sequence(obs[None], params, hidden_state)
    return values[0], hidden_state


# --------------------------------------------------------------------------
# Parameters (packed layout)
# --------------------------------------------------------------------------
def init_params(key, obs_dim, hidden, weight_dtype=jnp.float32):
    """PyTorch-style U(-1/sqrt(H), 1/sqrt(H)) init, packed for the kernel.

    weight_dtype=jnp.bfloat16 halves resident weight VMEM / the one-time HBM DMA
    and feeds the bf16 MXU natively on v6e/v7x (f32 accumulation kept in-kernel).
    """
    obs_pad = _round_up(obs_dim, 8)            # sublane-aligned W_ih / W_hh boundary
    keys = jax.random.split(key, 6)
    bound = hidden ** -0.5
    u = lambda k, shape: jax.random.uniform(k, shape, jnp.float32, -bound, bound)
    w_ih = u(keys[0], (obs_dim, 4 * hidden))   # stored pre-transposed (in, out)
    w_hh = u(keys[1], (hidden, 4 * hidden))
    b_ih = u(keys[2], (4 * hidden,))
    b_hh = u(keys[3], (4 * hidden,))
    w_fc = u(keys[4], (1, hidden))             # fc weight as a row
    b_fc = u(keys[5], (1,))
    w_gates = jnp.zeros((obs_pad + hidden, 4 * hidden), jnp.float32)
    w_gates = w_gates.at[:obs_dim].set(w_ih).at[obs_pad:].set(w_hh)
    return {
        "w_gates": w_gates.astype(weight_dtype),            # (obs_pad + H, 4H)
        "b_gates": (b_ih + b_hh).reshape(1, 4 * hidden),    # f32
        "w_fc": w_fc.astype(weight_dtype),                  # (1, H)
        "b_fc": b_fc.reshape(1, 1),                         # f32
    }


# --------------------------------------------------------------------------
# Pure-JAX references
# --------------------------------------------------------------------------
def _ref_step(params, x, h, c):
    H = params["w_fc"].shape[1]
    OP = params["w_gates"].shape[0] - H
    wg = params["w_gates"].astype(jnp.float32)
    xp = jnp.pad(x, ((0, 0), (0, OP - x.shape[-1])))
    gates = xp @ wg[:OP] + h @ wg[OP:] + params["b_gates"]
    i = jax.nn.sigmoid(gates[:, 0 * H:1 * H])
    f = jax.nn.sigmoid(gates[:, 1 * H:2 * H])
    g = jnp.tanh(gates[:, 2 * H:3 * H])
    o = jax.nn.sigmoid(gates[:, 3 * H:4 * H])
    c_new = f * c + i * g
    h_new = o * jnp.tanh(c_new)
    value = jnp.sum(h_new * params["w_fc"].astype(jnp.float32), axis=-1,
                    keepdims=True) + params["b_fc"]
    return value, h_new, c_new


def _ref_sequence(params, obs_seq, h0, c0):
    def step(carry, x):
        h, c = carry
        v, h, c = _ref_step(params, x, h, c)
        return (h, c), v
    (hT, cT), vals = jax.lax.scan(step, (h0, c0), obs_seq)
    return vals, hT, cT


# --------------------------------------------------------------------------
if __name__ == "__main__":
    B, OBS_DIM, HIDDEN, T = 4, 8, 32, 8

    key = jax.random.PRNGKey(0)
    k_obs, k_seq, k_param = jax.random.split(key, 3)
    params = init_params(k_param, OBS_DIM, HIDDEN)
    obs = jax.random.normal(k_obs, (B, OBS_DIM), jnp.float32)
    obs_seq = jax.random.normal(k_seq, (T, B, OBS_DIM), jnp.float32)

    h0 = jnp.zeros((B, HIDDEN), jnp.float32)
    c0 = jnp.zeros((B, HIDDEN), jnp.float32)
    v1_r, h1_r, c1_r = _ref_step(params, obs, h0, c0)
    v2_r, h2_r, c2_r = _ref_step(params, obs, h1_r, c1_r)
    vseq_r, hT_r, cT_r = _ref_sequence(params, obs_seq, h0, c0)

    # 1) single-step forward, hidden_state=None (matches module.forward)
    v1, (h1, c1) = recurrent_value_forward(obs, params)
    jax.block_until_ready((v1, h1, c1))
    assert v1.shape == (B, 1) and h1.shape == (1, B, HIDDEN) and c1.shape == (1, B, HIDDEN)
    assert jnp.allclose(v1, v1_r, atol=1e-4), "value mismatch (step 1)"
    assert jnp.allclose(h1[0], h1_r, atol=1e-4), "h mismatch (step 1)"
    assert jnp.allclose(c1[0], c1_r, atol=1e-4), "c mismatch (step 1)"

    # 2) second recurrent step feeding the returned hidden state (no donation now)
    v2, (h2, c2) = recurrent_value_forward(obs, params, hidden_state=(h1, c1))
    jax.block_until_ready((v2, h2, c2))
    assert jnp.allclose(v2, v2_r, atol=1e-4), "value mismatch (step 2)"
    assert jnp.allclose(h2[0], h2_r, atol=1e-4), "h mismatch (step 2)"
    assert jnp.allclose(c2[0], c2_r, atol=1e-4), "c mismatch (step 2)"

    # 3) fused multi-timestep rollout: one pallas_call, chunked time axis
    vseq, (hT, cT) = recurrent_value_sequence(obs_seq, params)
    jax.block_until_ready((vseq, hT, cT))
    assert vseq.shape == (T, B, 1)
    assert jnp.allclose(vseq, vseq_r, atol=5e-4), "sequence values mismatch"
    assert jnp.allclose(hT[0], hT_r, atol=5e-4), "sequence h_n mismatch"
    assert jnp.allclose(cT[0], cT_r, atol=5e-4), "sequence c_n mismatch"

    # 4) ragged T (exercises time padding + frozen-carry guard) with a small chunk
    T2 = 11
    obs_seq2 = jax.random.normal(jax.random.PRNGKey(1), (T2, B, OBS_DIM), jnp.float32)
    v2seq_r, hT2_r, cT2_r = _ref_sequence(params, obs_seq2, h0, c0)
    v2seq, (hT2, cT2) = recurrent_value_sequence(obs_seq2, params, time_block=8)
    jax.block_until_ready((v2seq, hT2, cT2))
    assert v2seq.shape == (T2, B, 1)
    assert jnp.allclose(v2seq, v2seq_r, atol=5e-4), "ragged values mismatch"
    assert jnp.allclose(hT2[0], hT2_r, atol=5e-4), "ragged h_n mismatch"
    assert jnp.allclose(cT2[0], cT2_r, atol=5e-4), "ragged c_n mismatch"

    # 5) bf16 weights (v6e/v7x recommendation); loose tolerance vs f32 reference
    params_bf16 = init_params(k_param, OBS_DIM, HIDDEN, weight_dtype=jnp.bfloat16)
    vb_r, hb_r, _ = _ref_sequence(params_bf16, obs_seq, h0, c0)
    vb, (hb, cb) = recurrent_value_sequence(obs_seq, params_bf16)
    jax.block_until_ready((vb, hb, cb))
    assert jnp.allclose(vb, vb_r, atol=5e-2), "bf16 values mismatch"
    assert jnp.allclose(hb[0], hb_r, atol=5e-2), "bf16 h_n mismatch"

    print("KERNEL_OK")
</pallas_src>

<mosaic_0001>
module attributes {stable_mosaic.version = 11 : i64} {
  func.func @_lstm_value_kernel(%arg0: i32, %arg1: i32, %arg2: memref<1x4x8xf32, #tpu.memory_space<vmem>>, %arg3: memref<4x32xf32, #tpu.memory_space<vmem>>, %arg4: memref<4x32xf32, #tpu.memory_space<vmem>>, %arg5: memref<40x128xf32, #tpu.memory_space<vmem>>, %arg6: memref<1x128xf32, #tpu.memory_space<vmem>>, %arg7: memref<1x32xf32, #tpu.memory_space<vmem>>, %arg8: memref<1x1xf32, #tpu.memory_space<vmem>>, %arg9: memref<1x1x4xf32, #tpu.memory_space<vmem>>, %arg10: memref<4x32xf32, #tpu.memory_space<vmem>>, %arg11: memref<4x32xf32, #tpu.memory_space<vmem>>, %arg12: memref<1x4x32xf32, #tpu.memory_space<vmem>>) attributes {dimension_semantics = [#tpu.dimension_semantics<parallel>, #tpu.dimension_semantics<arbitrary>], iteration_bounds = array<i64: 1, 1>, scalar_prefetch = 0 : i64, scratch_operands = 1 : i64, tpu.core_type = #tpu.core_type<tc>, window_params = [{transform_indices = @transform_0, window_bounds = array<i64: 1, 4, 8>}, {transform_indices = @transform_1, window_bounds = array<i64: 4, 32>}, {transform_indices = @transform_2, window_bounds = array<i64: 4, 32>}, {pipeline_mode = #tpu.pipeline_mode<synchronous>, transform_indices = @transform_3, window_bounds = array<i64: 40, 128>}, {pipeline_mode = #tpu.pipeline_mode<synchronous>, transform_indices = @transform_4, window_bounds = array<i64: 1, 128>}, {pipeline_mode = #tpu.pipeline_mode<synchronous>, transform_indices = @transform_5, window_bounds = array<i64: 1, 32>}, {pipeline_mode = #tpu.pipeline_mode<synchronous>, transform_indices = @transform_6, window_bounds = array<i64: 1, 1>}, {transform_indices = @transform_7, window_bounds = array<i64: 1, 1, 4>}, {transform_indices = @transform_8, window_bounds = array<i64: 4, 32>}, {transform_indices = @transform_9, window_bounds = array<i64: 4, 32>}]} {
    %c0_i32 = arith.constant 0 : i32
    %0 = arith.cmpi eq, %arg1, %c0_i32 : i32
    %1 = arith.extui %0 : i1 to i32
    %c0_i32_0 = arith.constant 0 : i32
    %2 = arith.cmpi ne, %1, %c0_i32_0 : i32
    scf.if %2 {
      %c0_31 = arith.constant 0 : index
      %c0_32 = arith.constant 0 : index
      %56 = vector.load %arg3[%c0_31, %c0_32] : memref<4x32xf32, #tpu.memory_space<vmem>>, vector<4x32xf32>
      %c0_33 = arith.constant 0 : index
      %c0_34 = arith.constant 0 : index
      %57 = vector.load %arg10[%c0_33, %c0_34] : memref<4x32xf32, #tpu.memory_space<vmem>>, vector<4x32xf32>
      tpu.vector_store %arg10[%c0_33, %c0_34], %56 {strides = array<i32>} : memref<4x32xf32, #tpu.memory_space<vmem>>, vector<4x32xf32>,
      %c0_35 = arith.constant 0 : index
      %c0_36 = arith.constant 0 : index
      %58 = vector.load %arg4[%c0_35, %c0_36] : memref<4x32xf32, #tpu.memory_space<vmem>>, vector<4x32xf32>
      %c0_37 = arith.constant 0 : index
      %c0_38 = arith.constant 0 : index
      %59 = vector.load %arg11[%c0_37, %c0_38] : memref<4x32xf32, #tpu.memory_space<vmem>>, vector<4x32xf32>
      tpu.vector_store %arg11[%c0_37, %c0_38], %58 {strides = array<i32>} : memref<4x32xf32, #tpu.memory_space<vmem>>, vector<4x32xf32>,
    } else {
    }
    %c0 = arith.constant 0 : index
    %c0_1 = arith.constant 0 : index
    %3 = vector.load %arg5[%c0, %c0_1] : memref<40x128xf32, #tpu.memory_space<vmem>>, vector<8x128xf32>
    %c8 = arith.constant 8 : index
    %c0_2 = arith.constant 0 : index
    %4 = vector.load %arg5[%c8, %c0_2] : memref<40x128xf32, #tpu.memory_space<vmem>>, vector<32x128xf32>
    %c0_3 = arith.constant 0 : index
    %c0_4 = arith.constant 0 : index
    %5 = vector.load %arg6[%c0_3, %c0_4] : memref<1x128xf32, #tpu.memory_space<vmem>>, vector<1x128xf32>
    %c0_5 = arith.constant 0 : index
    %c0_6 = arith.constant 0 : index
    %6 = vector.load %arg10[%c0_5, %c0_6] : memref<4x32xf32, #tpu.memory_space<vmem>>, vector<4x32xf32>
    %c0_7 = arith.constant 0 : index
    %c0_8 = arith.constant 0 : index
    %7 = vector.load %arg11[%c0_7, %c0_8] : memref<4x32xf32, #tpu.memory_space<vmem>>, vector<4x32xf32>
    %c0_i32_9 = arith.constant 0 : i32
    %8 = arith.index_cast %c0_i32_9 : i32 to index
    %c0_10 = arith.constant 0 : index
    %c0_11 = arith.constant 0 : index
    %9 = vector.load %arg2[%8, %c0_10, %c0_11] : memref<1x4x8xf32, #tpu.memory_space<vmem>>, vector<1x4x8xf32>
    %10 = vector.shape_cast %9 : vector<1x4x8xf32> to vector<4x8xf32>
    %cst = arith.constant dense<0.000000e+00> : vector<4x128xf32>
    %11 = tpu.matmul %10, %3, %cst {dimension_numbers = #tpu.dot_dimension_numbers<[1], [0], [0], [1], [0, 0, 1, 1], [], []>} : vector<4x8xf32>, vector<8x128xf32>, vector<4x128xf32> -> vector<4x128xf32>
    %cst_12 = arith.constant dense<0.000000e+00> : vector<4x128xf32>
    %12 = tpu.matmul %6, %4, %cst_12 {dimension_numbers = #tpu.dot_dimension_numbers<[1], [0], [0], [1], [0, 0, 1, 1], [], []>} : vector<4x32xf32>, vector<32x128xf32>, vector<4x128xf32> -> vector<4x128xf32>
    %13 = arith.addf %11, %12 : vector<4x128xf32>
    %14 = vector.broadcast %5 : vector<1x128xf32> to vector<4x128xf32>
    %15 = arith.addf %13, %14 : vector<4x128xf32>
    %16 = tpu.iota {dimensions = array<i32: 1>} : vector<4x128xi32>
    %c64_i32 = arith.constant 64 : i32
    %17 = vector.broadcast %c64_i32 : i32 to vector<4x128xi32>
    %18 = arith.cmpi sge, %16, %17 : vector<4x128xi32>
    %c96_i32 = arith.constant 96 : i32
    %19 = vector.broadcast %c96_i32 : i32 to vector<4x128xi32>
    %20 = arith.cmpi slt, %16, %19 : vector<4x128xi32>
    %21 = arith.andi %18, %20 : vector<4x128xi1>
    %22 = math.tanh %15 : vector<4x128xf32>
    %23 = arith.negf %15 : vector<4x128xf32>
    %24 = math.exp %23 : vector<4x128xf32>
    %cst_13 = arith.constant 1.000000e+00 : f32
    %25 = vector.broadcast %cst_13 : f32 to vector<4x128xf32>
    %26 = arith.addf %25, %24 : vector<4x128xf32>
    %27 = arith.divf %25, %26 : vector<4x128xf32>
    %28 = arith.select %21, %22, %27 : vector<4x128xi1>, vector<4x128xf32>
    %29 = vector.extract_strided_slice %28 {offsets = [0, 0], sizes = [4, 32], strides = [1, 1]} : vector<4x128xf32> to vector<4x32xf32>
    %30 = vector.extract_strided_slice %28 {offsets = [0, 32], sizes = [4, 32], strides = [1, 1]} : vector<4x128xf32> to vector<4x32xf32>
    %31 = vector.extract_strided_slice %28 {offsets = [0, 64], sizes = [4, 32], strides = [1, 1]} : vector<4x128xf32> to vector<4x32xf32>
    %32 = vector.extract_strided_slice %28 {offsets = [0, 96], sizes = [4, 32], strides = [1, 1]} : vector<4x128xf32> to vector<4x32xf32>
    %33 = arith.mulf %30, %7 : vector<4x32xf32>
    %34 = arith.mulf %29, %31 : vector<4x32xf32>
    %35 = arith.addf %33, %34 : vector<4x32xf32>
    %36 = math.tanh %35 : vector<4x32xf32>
    %37 = arith.mulf %32, %36 : vector<4x32xf32>
    %38 = arith.index_cast %c0_i32_9 : i32 to index
    %c0_14 = arith.constant 0 : index
    %c0_15 = arith.constant 0 : index
    %39 = vector.load %arg12[%38, %c0_14, %c0_15] : memref<1x4x32xf32, #tpu.memory_space<vmem>>, vector<1x4x32xf32>
    %40 = vector.shape_cast %39 : vector<1x4x32xf32> to vector<4x32xf32>
    %41 = vector.shape_cast %37 : vector<4x32xf32> to vector<1x4x32xf32>
    tpu.vector_store %arg12[%38, %c0_14, %c0_15], %41 {strides = array<i32>} : memref<1x4x32xf32, #tpu.memory_space<vmem>>, vector<1x4x32xf32>,
    %c1_i32 = arith.constant 1 : i32
    %c0_16 = arith.constant 0 : index
    %c0_17 = arith.constant 0 : index
    %42 = vector.load %arg10[%c0_16, %c0_17] : memref<4x32xf32, #tpu.memory_space<vmem>>, vector<4x32xf32>
    tpu.vector_store %arg10[%c0_16, %c0_17], %37 {strides = array<i32>} : memref<4x32xf32, #tpu.memory_space<vmem>>, vector<4x32xf32>,
    %c0_18 = arith.constant 0 : index
    %c0_19 = arith.constant 0 : index
    %43 = vector.load %arg11[%c0_18, %c0_19] : memref<4x32xf32, #tpu.memory_space<vmem>>, vector<4x32xf32>
    tpu.vector_store %arg11[%c0_18, %c0_19], %35 {strides = array<i32>} : memref<4x32xf32, #tpu.memory_space<vmem>>, vector<4x32xf32>,
    %c0_20 = arith.constant 0 : index
    %c0_21 = arith.constant 0 : index
    %44 = vector.load %arg7[%c0_20, %c0_21] : memref<1x32xf32, #tpu.memory_space<vmem>>, vector<1x32xf32>
    %45 = vector.shape_cast %44 : vector<1x32xf32> to vector<1x1x32xf32>
    %c0_22 = arith.constant 0 : index
    %c0_23 = arith.constant 0 : index
    %c0_24 = arith.constant 0 : index
    %46 = vector.load %arg12[%c0_22, %c0_23, %c0_24] : memref<1x4x32xf32, #tpu.memory_space<vmem>>, vector<1x4x32xf32>
    %47 = vector.broadcast %45 : vector<1x1x32xf32> to vector<1x4x32xf32>
    %48 = arith.mulf %46, %47 : vector<1x4x32xf32>
    %cst_25 = arith.constant dense<0.000000e+00> : vector<1x4xf32>
    %49 = vector.multi_reduction <add>, %48, %cst_25 [2] : vector<1x4x32xf32> to vector<1x4xf32>
    %c0_26 = arith.constant 0 : index
    %c0_27 = arith.constant 0 : index
    %50 = vector.load %arg8[%c0_26, %c0_27] : memref<1x1xf32, #tpu.memory_space<vmem>>, vector<1x1xf32>
    %51 = vector.broadcast %50 : vector<1x1xf32> to vector<1x4xf32>
    %52 = arith.addf %49, %51 : vector<1x4xf32>
    %c0_28 = arith.constant 0 : index
    %c0_29 = arith.constant 0 : index
    %c0_30 = arith.constant 0 : index
    %53 = vector.load %arg9[%c0_28, %c0_29, %c0_30] : memref<1x1x4xf32, #tpu.memory_space<vmem>>, vector<1x1x4xf32>
    %54 = vector.shape_cast %53 : vector<1x1x4xf32> to vector<1x4xf32>
    %55 = vector.shape_cast %52 : vector<1x4xf32> to vector<1x1x4xf32>
    tpu.vector_store %arg9[%c0_28, %c0_29, %c0_30], %55 {strides = array<i32>} : memref<1x1x4xf32, #tpu.memory_space<vmem>>, vector<1x1x4xf32>,
    return
  }
  func.func @transform_0(%arg0: i32, %arg1: i32) -> (i32, i32, i32) {
    %c0_i32 = arith.constant 0 : i32
    %c0_i32_0 = arith.constant 0 : i32
    return %arg1, %arg0, %c0_i32 : i32, i32, i32
  }
  func.func @transform_1(%arg0: i32, %arg1: i32) -> (i32, i32) {
    %c0_i32 = arith.constant 0 : i32
    %c0_i32_0 = arith.constant 0 : i32
    return %arg0, %c0_i32 : i32, i32
  }
  func.func @transform_2(%arg0: i32, %arg1: i32) -> (i32, i32) {
    %c0_i32 = arith.constant 0 : i32
    %c0_i32_0 = arith.constant 0 : i32
    return %arg0, %c0_i32 : i32, i32
  }
  func.func @transform_3(%arg0: i32, %arg1: i32) -> (i32, i32) {
    %c0_i32 = arith.constant 0 : i32
    %c0_i32_0 = arith.constant 0 : i32
    %c0_i32_1 = arith.constant 0 : i32
    return %c0_i32, %c0_i32_0 : i32, i32
  }
  func.func @transform_4(%arg0: i32, %arg1: i32) -> (i32, i32) {
    %c0_i32 = arith.constant 0 : i32
    %c0_i32_0 = arith.constant 0 : i32
    %c0_i32_1 = arith.constant 0 : i32
    return %c0_i32, %c0_i32_0 : i32, i32
  }
  func.func @transform_5(%arg0: i32, %arg1: i32) -> (i32, i32) {
    %c0_i32 = arith.constant 0 : i32
    %c0_i32_0 = arith.constant 0 : i32
    %c0_i32_1 = arith.constant 0 : i32
    return %c0_i32, %c0_i32_0 : i32, i32
  }
  func.func @transform_6(%arg0: i32, %arg1: i32) -> (i32, i32) {
    %c0_i32 = arith.constant 0 : i32
    %c0_i32_0 = arith.constant 0 : i32
    %c0_i32_1 = arith.constant 0 : i32
    return %c0_i32, %c0_i32_0 : i32, i32
  }
  func.func @transform_7(%arg0: i32, %arg1: i32) -> (i32, i32, i32) {
    %c0_i32 = arith.constant 0 : i32
    %c0_i32_0 = arith.constant 0 : i32
    return %arg0, %arg1, %c0_i32 : i32, i32, i32
  }
  func.func @transform_8(%arg0: i32, %arg1: i32) -> (i32, i32) {
    %c0_i32 = arith.constant 0 : i32
    %c0_i32_0 = arith.constant 0 : i32
    return %arg0, %c0_i32 : i32, i32
  }
  func.func @transform_9(%arg0: i32, %arg1: i32) -> (i32, i32) {
    %c0_i32 = arith.constant 0 : i32
    %c0_i32_0 = arith.constant 0 : i32
    return %arg0, %c0_i32 : i32, i32
  }
}

</mosaic_0001>

<bundles_post_ra>
// kernel: tpu_custom_call.1
= control target key start
LH: loop header
LB: loop body
LE: loop exit
PB: predicated region body
PF: predicated region fallthrough
CT: control target
= control target key end

     0   :  { %s601_s0 = inlined_call_operand.hbm [shape: f32[1,4,8], index: 0, kind: input, shape index: {}]   ;;  %s602_s1 = inlined_call_operand.hbm [shape: f32[4,32], index: 1, kind: input, shape index: {}]   ;;  %s603_s2 = inlined_call_operand.hbm [shape: f32[4,32], index: 2, kind: input, shape index: {}]   ;;  %s604_s3 = inlined_call_operand.hbm [shape: f32[40,128], index: 3, kind: input, shape index: {}]   ;;  %s605_s4 = inlined_call_operand.vmem [shape: f32[1,128], index: 4, kind: input, shape index: {}]   ;;  %s606_s5 = inlined_call_operand.vmem [shape: f32[1,32], index: 5, kind: input, shape index: {}]   ;;  %s607_s6 = inlined_call_operand.<no memory space> [shape: f32[1,1], index: 6, kind: input, shape index: {}]   ;;  %s608_s7 = inlined_call_operand.hbm [shape: f32[1,1,4], index: 7, kind: output, shape index: {0}]   ;;  %s609_s8 = inlined_call_operand.hbm [shape: f32[4,32], index: 8, kind: output, shape index: {1}]   ;;  %s610_s9 = inlined_call_operand.hbm [shape: f32[4,32], index: 9, kind: output, shape index: {2}]  }
   0x1   :  { %v15_v0 = vstv %s607_s6 }
   0x2   :  { %16 = vst [vmem:[#allocation3] sm:$0x1] %v15_v0 }
   0x3   :  { %17 = vsyncpa [#allocation5], 0 }
   0x4   :  { %18 = vsyncpa [#allocation8], 0 }
   0x5   :  { %19 = vsyncpa [#allocation11], 0 }
   0x6   :  { %20 = vsyncpa [#allocation6], 0  ;;  %s38_s13 = sshll.u32 %s602_s1, 4  ;;  %s39_s13 = int_to_ptr.hbm [resolvable:$true] %s38_s13 }
   0x7   :  { %21 = vsyncpa [#allocation14], 0  ;;  %s497_s14 = smov [#allocation7]   ;;  %s27_s18 = sshll.u32 %s601_s0, 4  ;;  %s28_s18 = int_to_ptr.hbm [resolvable:$true] %s27_s18 }
   0x8   :  { %s40_s15 = sshll.u32 %s497_s14, 4  ;;  %s498_s6 = smov [#allocation4]   ;;  %s41_s15 = int_to_ptr.vmem [resolvable:$true] %s40_s15 }
   0x9   :  { %43 = dma.hbm_to_vmem [thread:$0]  %s39_s13, 64, %s41_s15, [#allocation8]  }
   0xa   :  { %s29_s19 = sshll.u32 %s498_s6, 4  ;;  %s49_s22 = sshll.u32 %s603_s2, 4  ;;  %s30_s19 = int_to_ptr.vmem [resolvable:$true] %s29_s19  ;;  %s50_s22 = int_to_ptr.hbm [resolvable:$true] %s49_s22 }
   0xb   :  { %32 = dma.hbm_to_vmem [thread:$0]  %s28_s18, 64, %s30_s19, [#allocation5]  }
   0xc   :  { %s59_s24 = sshll.u32 %s604_s3, 4  ;;  %s499_s25 = smov [#allocation9]   ;;  %s60_s24 = int_to_ptr.hbm [resolvable:$true] %s59_s24 }
   0xd   :  { %s51_s26 = sshll.u32 %s499_s25, 4  ;;  %s500_s0 = smov [#allocation10]   ;;  %s52_s26 = int_to_ptr.vmem [resolvable:$true] %s51_s26 }
   0xe   :  { %54 = dma.hbm_to_vmem [thread:$0]  %s50_s22, 64, %s52_s26, [#allocation8]  }
   0xf   :  { %s61_s27 = sshll.u32 %s500_s0, 4  ;;  %s501_s28 = smov 128   ;;  %s62_s27 = int_to_ptr.vmem [resolvable:$true] %s61_s27 }
  0x10   :  { %s502_s29 = smov 8  }
  0x11   :  { %67 = dma.hbm_to_vmem [thread:$0]  %s60_s24, 640, %s62_s27, [#allocation11], %s501_s28, %s501_s28, %s502_s29  }
  0x12   :  { %487 = dma.done.wait [#allocation5], 64  }
  0x13   :  { %488 = vsyncadd [#allocation5], 4294967232 }
  0x14   :  { %489 = dma.done.wait [#allocation8], 128  }
  0x15   :  { %490 = vsyncadd [#allocation8], 4294967168 }
  0x16   :  { %491 = dma.done.wait [#allocation11], 640  }
  0x17   :  { %492 = vsyncadd [#allocation11], 4294966656  ;;  %vm95_vm0 = vcmask 257024   ;;  %v103_v1 = vld [vmem:[#allocation10 + $0x20] sm:$0xff]  ;;  %v102_v2 = vld [vmem:[#allocation10 + $0x18] sm:$0xff]  ;;  %vm132_vm1 = vcmask 64512   ;;  %v160_v18 = vlaneseq }
  0x18   :  { %124 = vmatpush.msra.mxu0 %v103_v1  ;;  %v101_v3 = vld [vmem:[#allocation10 + $0x10] sm:$0xff]  ;;  %v99_v4 = vld [vmem:[#allocation10] sm:$0xff]  ;;  %v94_v5 = vld [vmem:[#allocation7] sm:$0xf]  ;;  %vm108_vm2 = vcmask 261120   ;;  %s504_s30 = smov 32  }
  0x19   :  { %151 = vmatpush.msra.mxu1 %v99_v4  ;;  %96 = vst.msk [vmem:[#allocation13] sm:$0xf] %vm95_vm0, %v94_v5  ;;  %v107_v6 = vld [vmem:[#allocation4] sm:$0xf]  ;;  %v100_v7 = vld [vmem:[#allocation10 + $0x8] sm:$0xff]  ;;  %v580_v20 = vand.u32 127, %v160_v18 }
  0x1a   :  { %125 = vmatpush.msra.mxu0 %v102_v2  ;;  %292 = vmatmul.msk.f32.vlgmr.msra.gmra.mxu1 %vm132_vm1, %v107_v6  ;;  %v309_v10 = vld [vmem:[%s605_s4] ss:$0 sm:$0xff]  ;;  %v97_v13 = vld [vmem:[#allocation9] sm:$0xf]  ;;  %s503_s4 = smov 64   ;;  %s505_s10 = smov 96  }
  0x1b   :  { %98 = vst.msk [vmem:[#allocation15] sm:$0xf] %vm95_vm0, %v97_v13  ;;  %vm162_vm3 = vcmp.ge.s32.totalorder %v580_v20, 64  ;;  %vm163_vm4 = vcmp.lt.s32.totalorder %v580_v20, 96  ;;  %v228_v43 = vld [vmem:[#allocation3] sm:$0x1] }
  0x1c   :  { %126 = vmatpush.msra.mxu0 %v101_v3  ;;  %vm164_vm6 = vmand %vm162_vm3, %vm163_vm4  ;;  %v506_v44 = vmov 0   ;;  %s259_s13 = sshll.u32 %s609_s8, 4  ;;  %s507_s14 = smov [#allocation13]   ;;  %v310_v46 = vld [vmem:[%s606_s5] ss:$0 sm:$0xff]  ;;  %vm239_vm10 = vcmask 24576   ;;  %s260_s13 = int_to_ptr.hbm [resolvable:$true] %s259_s13 }
  0x1d   :  { %307 = vset.pattern.permute.xlu2 %v506_v44  ;;  %308 = vset.pattern.permute.xlu0 %v506_v44  ;;  %s257_s15 = sshll.u32 %s507_s14, 4  ;;  %s270_s19 = sshll.u32 %s610_s9, 4  ;;  %s258_s15 = int_to_ptr.vmem [resolvable:$true] %s257_s15  ;;  %s271_s19 = int_to_ptr.hbm [resolvable:$true] %s270_s19 }
  0x1e   :  { %127 = vmatpush.msra.mxu0 %v100_v7  ;;  %s508_s20 = smov [#allocation15]   ;;  %s509_s8 = smov [#allocation12]  }
  0x1f   :  { %s268_s21 = sshll.u32 %s508_s20, 4  ;;  %s246_s5 = sshll.u32 %s509_s8, 4  ;;  %s269_s21 = int_to_ptr.vmem [resolvable:$true] %s268_s21  ;;  %s247_s5 = int_to_ptr.vmem [resolvable:$true] %s246_s5 }
  0x20   :  { %v105_v8 = vld [vmem:[#allocation13] sm:$0xf]  ;;  %s248_s23 = sshll.u32 %s608_s7, 4  ;;  %s249_s23 = int_to_ptr.hbm [resolvable:$true] %s248_s23 }
  0x21   :  { %291 = vmatmul.msk.f32.vlgmr.msra.gmra.mxu0 %vm108_vm2, %v105_v8 }
  0x22   :  { %v106_v32 = vld [vmem:[#allocation15] sm:$0xf] }
  0x97   :  { %v153_v9 = vpop.f32.mrf.mxu1 }
  0x9e   :  { %v129_v11 = vpop.f32.mrf.mxu0 }
  0x9f   :  { %v154_v12 = vadd.f32 %v153_v9, %v129_v11 }
  0xa1   :  { %v159_v14 = vadd.f32 %v309_v10, %v154_v12 }
  0xa3   :  { %v293_v15 = vmul.f32 -1.442695, %v159_v14 }
  0xa5   :  { %311 = vpow2.f32 %v293_v15 }
  0xab   :  { %v312_v16 = vpop.eup %311 }
  0xac   :  { %v169_v17 = vadd.f32 1.0, %v312_v16 }
  0xae   :  { %313 = vrcp.f32 %v169_v17  ;;  %v181_v23 = vand.u32 2147483648, %v169_v17  ;;  %v179_v25 = vand.u32 2147483647, %v169_v17  ;;  %vm175_vm7 = vweird.f32 %v169_v17 }
  0xaf   :  { %315 = vtanh.f32 %v159_v14 }
  0xb0   :  { %v182_v27 = vor.u32 1.1754944e-38, %v181_v23  ;;  %vm180_vm9 = vcmp.eq.f32.partialorder %v179_v25, 8.507059e+37 }
  0xb4   :  { %v314_v19 = vpop.eup %313 }
  0xb5   :  { %v171_v21 = vmul.f32 %v314_v19, %v169_v17  ;;  %vm176_vm5 = vweird.f32 %v314_v19  ;;  %v316_v29 = vpop.eup %315 }
  0xb6   :  { %vm177_vm8 = vmor %vm175_vm7, %vm176_vm5 }
  0xb7   :  { %v172_v22 = vsub.f32 1.0, %v171_v21 }
  0xb9   :  { %v173_v24 = vmul.f32 %v314_v19, %v172_v22 }
  0xbb   :  { %v174_v26 = vadd.f32 %v314_v19, %v173_v24 }
  0xbd   :  { %v178_v28 = vsel %vm177_vm8, %v314_v19, %v174_v26 }
  0xbe   :  { %v183_v30 = vsel %vm180_vm9, %v182_v27, %v178_v28 }
  0xbf   :  { %v185_v31 = vsel %vm164_vm6, %v316_v29, %v183_v30 }
  0xc0   :  { %192 = vrot.lane.b32.xlu0 %v185_v31, %s503_s4 }
  0xc8   :  { %187 = vrot.lane.b32.xlu0 %v106_v32, %s504_s30 }
 0x132   :  { %v193_v33 = vpop.permute.xlu0 %192 }
 0x133   :  { %v195_v34 = vmul.f32 %v193_v33, %v185_v31 }
 0x135   :  { %197 = vrot.lane.b32.xlu1 %v195_v34, %s504_s30 }
 0x13a   :  { %v188_v35 = vpop.permute.xlu0 %187 }
 0x13b   :  { %v190_v36 = vmul.f32 %v188_v35, %v185_v31 }
 0x1a7   :  { %v198_v37 = vpop.permute.xlu1 %197 }
 0x1a8   :  { %v200_v38 = vadd.f32 %v198_v37, %v190_v36 }
 0x1aa   :  { %317 = vtanh.f32 %v200_v38 }
 0x1b0   :  { %v318_v39 = vpop.eup %317 }
 0x1b1   :  { %203 = vrot.lane.b32.xlu1 %v318_v39, %s503_s4 }
 0x1b9   :  { %215 = vrot.lane.b32.xlu1 %v200_v38, %s505_s10 }
 0x223   :  { %v204_v40 = vpop.permute.xlu1 %203 }
 0x224   :  { %v206_v41 = vmul.f32 %v204_v40, %v185_v31 }
 0x226   :  { %208 = vrot.lane.b32.xlu2 %v206_v41, %s504_s30 }
 0x22b   :  { %v216_v42 = vpop.permute.xlu1 %215 }
 0x22c   :  { %218 = vst.msk [vmem:[#allocation15] sm:$0xf] %vm95_vm0, %v216_v42 }
 0x22e   :  { %231 = vperm.xlu2 %307, %v228_v43  }
 0x280   :  { %v209_v45 = vpop.permute.xlu2 %208 }
 0x281   :  { %212 = vst.msk [vmem:[#allocation2] sm:$0xf] %vm95_vm0, %v209_v45 }
 0x282   :  { %213 = vst.msk [vmem:[#allocation13] sm:$0xf] %vm95_vm0, %v209_v45 }
 0x283   :  { %262 = dma.vmem_to_hbm [thread:$0]  %s258_s15, 64, %s260_s13, [#allocation14]  }
 0x284   :  { %273 = dma.vmem_to_hbm [thread:$0]  %s269_s21, 64, %s271_s19, [#allocation14]  }
 0x288   :  { %v220_v47 = vld [vmem:[#allocation2] sm:$0xf]  ;;  %v232_v50 = vpop.permute.xlu2 %231 }
 0x289   :  { %v224_v48 = vmul.f32 %v310_v46, %v220_v47  ;;  %v234_v51 = vperm.slane %v232_v50, 0 }
 0x28b   :  { %v225_v49 = vsel %vm95_vm0, %v224_v48, 0.0 }
 0x28c   :  { %226 = vadd.xlane.f32.xlu0 %v225_v49 }
 0x2ff   :  { %v227_v52 = vpop.xlane.xlu0 %226 }
 0x300   :  { %v235_v53 = vadd.f32 %v234_v51, %v227_v52 }
 0x302   :  { %v237_v54 = vperm.slane %v235_v53, %v580_v20 }
 0x304   :  { %240 = vst.msk [vmem:[#allocation12] sm:$0x1] %vm239_vm10, %v237_v54 }
 0x305   :  { %251 = dma.vmem_to_hbm [thread:$0]  %s247_s5, 16, %s249_s23, [#allocation6]  }
 0x306   :  { %493 = dma.done.wait [#allocation6], 16  }
 0x307   :  { %494 = vsyncadd [#allocation6], 4294967280 }
 0x308   :  { %495 = dma.done.wait [#allocation14], 128  }
 0x309   :  { %496 = vsyncadd [#allocation14], 4294967168 }
 0x30a   :  { %286 = vsyncpa [#allocation5], 1 }
 0x30b   :  { %287 = vsyncpa [#allocation8], 1 }
 0x30c   :  { %288 = vsyncpa [#allocation11], 1 }
 0x30d   :  { %289 = vsyncpa [#allocation6], 1 }
 0x30e   :  { %290 = vsyncpa [#allocation14], 1 }

</bundles_post_ra>
